<compile_context>
chip_gen: v5e
topology: v5e:2x2
jax: 0.10.0
libtpu: 0.0.40
codegen_flags: <defaults>
</compile_context>

<pallas_src>
import functools
import math

import jax
import jax.numpy as jnp
from jax import lax
from jax.experimental import pallas as pl
from jax.experimental.pallas import tpu as pltpu

EPSILON = 1e-5
_LANES = 128
_SUBLANES = 8
_CHUNK_ROWS = 64                        # 8 vregs/chunk/input (f32); multiple of 32
_DEFAULT_BLOCK_BYTES = 2 * 1024 * 1024  # per-input per-block VMEM budget (safe everywhere)


def _dice_tiled_kernel(x_ref, t_ref, inter_ref, denom_ref, *, r_total, chunk_rows):
    """Grid step (row i, tile k): accumulate partials for one (n, c) row.

    x_ref, t_ref : (1, tile_rows, 128) logits / targets tile
    inter_ref    : (1, 8, 128) f32 running sum of sigmoid(x) * t   (resident over k)
    denom_ref    : (1, 8, 128) f32 running sum of sigmoid(x) + t
    """
    k = pl.program_id(1)
    tile_rows = x_ref.shape[1]
    n_chunks = tile_rows // chunk_rows          # static

    @pl.when(k == 0)
    def _init():
        inter_ref[...] = jnp.zeros_like(inter_ref)
        denom_ref[...] = jnp.zeros_like(denom_ref)

    rows_left = r_total - k * tile_rows         # valid rows in this tile (may exceed tile_rows)

    def chunk_sums(c, mask_rows):
        start = pl.multiple_of(c * chunk_rows, chunk_rows)
        x = x_ref[0, pl.ds(start, chunk_rows), :].astype(jnp.float32)
        t = t_ref[0, pl.ds(start, chunk_rows), :].astype(jnp.float32)
        # sigmoid via one EUP transcendental (tanh) instead of exp + recip.
        p = 0.5 + 0.5 * jnp.tanh(0.5 * x)
        pt = p * t
        pd = p + t
        if mask_rows:
            # Squash rows past the end of the real data (unspecified OOB tail of
            # the last tile).  Select (not multiply) so garbage NaNs die too.
            rid = lax.broadcasted_iota(jnp.int32, (chunk_rows, _LANES), 0) + start
            ok = rid < rows_left
            pt = jnp.where(ok, pt, 0.0)
            pd = jnp.where(ok, pd, 0.0)
        g = chunk_rows // _SUBLANES
        return (pt.reshape(g, _SUBLANES, _LANES).sum(axis=0),
                pd.reshape(g, _SUBLANES, _LANES).sum(axis=0))

    zeros = jnp.zeros((_SUBLANES, _LANES), jnp.float32)

    @pl.when(rows_left >= tile_rows)
    def _full_tile():                           # hot path: no masking at all
        def body(c, carry):
            ai, ad = carry
            di, dd = chunk_sums(c, mask_rows=False)
            return ai + di, ad + dd
        ai, ad = lax.fori_loop(0, n_chunks, body, (zeros, zeros), unroll=4)
        inter_ref[0] += ai
        denom_ref[0] += ad

    @pl.when(rows_left < tile_rows)
    def _partial_tile():                        # at most one tile per (n, c) row
        def body(c, carry):
            ai, ad = carry
            di, dd = chunk_sums(c, mask_rows=True)
            return ai + di, ad + dd
        ai, ad = lax.fori_loop(0, n_chunks, body, (zeros, zeros))
        inter_ref[0] += ai
        denom_ref[0] += ad


def _dice_rows_kernel(x_ref, t_ref, inter_ref, denom_ref):
    """Small-S path: fully reduce `rows_per_block` (n, c) rows in one grid step.

    x_ref, t_ref : (rows_per_block, R, 128)
    inter_ref    : (rows_per_block, 128)
    denom_ref    : (rows_per_block, 128)
    """
    x = x_ref[...].astype(jnp.float32)
    t = t_ref[...].astype(jnp.float32)
    p = 0.5 + 0.5 * jnp.tanh(0.5 * x)
    inter_ref[...] = (p * t).sum(axis=1)
    denom_ref[...] = (p + t).sum(axis=1)


def dice_loss(logits, target, *, epsilon=EPSILON, block_bytes=_DEFAULT_BLOCK_BYTES):
    """DiceLoss.forward(input, target) with default module settings. Scalar f32."""
    assert logits.shape == target.shape, \
        "'input' and 'target' must have the same shape"
    # TODO(synk): weight / ignore_index / skip_last_target / softmax normalization
    # (non-default module options) are not implemented.
    N, C = logits.shape[0], logits.shape[1]
    S = int(math.prod(logits.shape[2:])) if logits.ndim > 2 else 1
    NC = N * C

    def prep(a):
        # `.float()` in the reference; keep f32/bf16/f16 as-is (cast in-kernel).
        if (not jnp.issubdtype(a.dtype, jnp.floating)) or a.dtype.itemsize > 4:
            a = a.astype(jnp.float32)
        return a.reshape(NC, S)                 # free reshape, no transpose

    x = prep(logits)
    t = prep(target)

    # Only lane-pad when S is not already a multiple of 128.  The pad is genuine
    # zeros; its sigmoid(0)=0.5 contribution to the denominator is removed
    # analytically in the epilogue, so the kernels never mask for it.
    pad = (-S) % _LANES
    if pad:
        # TODO(synk): a manual-DMA path could avoid this HBM copy for unaligned S.
        x = jnp.pad(x, ((0, 0), (0, pad)))
        t = jnp.pad(t, ((0, 0), (0, pad)))
    R = (S + pad) // _LANES

    x = x.reshape(NC, R, _LANES)                # free split of the contiguous last dim
    t = t.reshape(NC, R, _LANES)

    itemsize = max(x.dtype.itemsize, t.dtype.itemsize)
    budget_elems = max(_CHUNK_ROWS * _LANES, block_bytes // itemsize)
    r_pad8 = -(-R // _SUBLANES) * _SUBLANES     # VMEM rows per (n, c) row (sublane pad)
    rows_fit = min(budget_elems // (r_pad8 * _LANES), 1024)

    if rows_fit >= 1 and (NC <= rows_fit or rows_fit >= _SUBLANES):
        # -------- small-S path: multiple (n, c) rows per grid step --------
        rb = NC if NC <= rows_fit else (rows_fit // _SUBLANES) * _SUBLANES
        inter_p, denom_p = pl.pallas_call(
            _dice_rows_kernel,
            out_shape=(
                jax.ShapeDtypeStruct((NC, _LANES), jnp.float32),
                jax.ShapeDtypeStruct((NC, _LANES), jnp.float32),
            ),
            grid_spec=pltpu.PrefetchScalarGridSpec(
                num_scalar_prefetch=0,
                grid=(pl.cdiv(NC, rb),),
                in_specs=[
                    pl.BlockSpec((rb, R, _LANES), lambda i: (i, 0, 0)),
                    pl.BlockSpec((rb, R, _LANES), lambda i: (i, 0, 0)),
                ],
                out_specs=(
                    pl.BlockSpec((rb, _LANES), lambda i: (i, 0)),
                    pl.BlockSpec((rb, _LANES), lambda i: (i, 0)),
                ),
            ),
            compiler_params=pltpu.CompilerParams(
                dimension_semantics=("parallel",)),
        )(x, t)
    else:
        # -------- large-S path: tile the reduction axis per (n, c) row --------
        chunk = _CHUNK_ROWS
        tile_cap = max(chunk, (budget_elems // _LANES) // chunk * chunk)
        tile_rows = min(pl.cdiv(R, chunk) * chunk, tile_cap)   # multiple of `chunk`
        grid_k = pl.cdiv(R, tile_rows)
        kernel = functools.partial(_dice_tiled_kernel, r_total=R, chunk_rows=chunk)
        # TODO(synk): on v7x, additionally split the k range over a leading parallel
        # axis so both TensorCores get work when N*C is 1 or odd.
        inter_p, denom_p = pl.pallas_call(
            kernel,
            out_shape=(
                jax.ShapeDtypeStruct((NC, _SUBLANES, _LANES), jnp.float32),
                jax.ShapeDtypeStruct((NC, _SUBLANES, _LANES), jnp.float32),
            ),
            grid_spec=pltpu.PrefetchScalarGridSpec(
                num_scalar_prefetch=0,
                grid=(NC, grid_k),
                in_specs=[
                    pl.BlockSpec((1, tile_rows, _LANES), lambda i, k: (i, k, 0)),
                    pl.BlockSpec((1, tile_rows, _LANES), lambda i, k: (i, k, 0)),
                ],
                out_specs=(
                    pl.BlockSpec((1, _SUBLANES, _LANES), lambda i, k: (i, 0, 0)),
                    pl.BlockSpec((1, _SUBLANES, _LANES), lambda i, k: (i, 0, 0)),
                ),
            ),
            compiler_params=pltpu.CompilerParams(
                dimension_semantics=("parallel", "arbitrary")),
        )(x, t)

    # Tiny epilogue: fold lane-dense partials into per-channel sums -> scalar loss.
    inter_c = inter_p.reshape(N, C, -1).sum(axis=(0, 2))     # (C,)
    denom_c = denom_p.reshape(N, C, -1).sum(axis=(0, 2))     # (C,)
    if pad:
        denom_c = denom_c - 0.5 * pad * N     # remove sigmoid(0)=0.5 pad contributions
    dice = 2.0 * inter_c / jnp.maximum(denom_c, epsilon)
    return jnp.mean(1.0 - dice)


def _dice_loss_ref(logits, target, epsilon=EPSILON):
    """Pure-JAX reference mirroring the PyTorch module."""
    C = logits.shape[1]
    perm = (1, 0) + tuple(range(2, logits.ndim))
    p = jax.nn.sigmoid(logits.astype(jnp.float32))
    p = jnp.transpose(p, perm).reshape(C, -1)
    t = jnp.transpose(target.astype(jnp.float32), perm).reshape(C, -1)
    inter = jnp.sum(p * t, axis=-1)
    denom = jnp.sum(p + t, axis=-1)
    dice = 2.0 * inter / jnp.maximum(denom, epsilon)
    return jnp.mean(1.0 - dice)


if __name__ == "__main__":
    key = jax.random.PRNGKey(0)
    k1, k2, k3, k4 = jax.random.split(key, 4)

    # Case 1: typical small volume (N, C, D, H, W) = (2, 4, 8, 16, 16) -> S = 2048.
    # Exercises the small-S multi-row path (no pad, no mask).
    N, C, D, H, W = 2, 4, 8, 16, 16
    logits = jax.random.normal(k1, (N, C, D, H, W), dtype=jnp.float32)
    target = (jax.random.uniform(k2, (N, C, D, H, W)) > 0.5).astype(jnp.float32)
    out = jax.block_until_ready(dice_loss(logits, target))
    ref = jax.block_until_ready(_dice_loss_ref(logits, target))
    assert jnp.allclose(out, ref, rtol=1e-4, atol=1e-4), (out, ref)

    # Case 2: force the k-tiled path (accumulator across k + masked final tile)
    # by shrinking the per-block byte budget.  S = 5*32*64 = 10240 -> R = 80.
    logits2 = jax.random.normal(k3, (2, 4, 5, 32, 64), dtype=jnp.float32)
    target2 = (jax.random.uniform(k4, (2, 4, 5, 32, 64)) > 0.5).astype(jnp.float32)
    out2 = jax.block_until_ready(dice_loss(logits2, target2, block_bytes=32 * 1024))
    ref2 = jax.block_until_ready(_dice_loss_ref(logits2, target2))
    assert jnp.allclose(out2, ref2, rtol=1e-4, atol=1e-4), (out2, ref2)

    # Case 3: S = 5*7*9 = 315 (not a multiple of 128) -> exercises the lane-pad
    # plus analytic denominator correction.
    logits3 = jax.random.normal(k1, (2, 3, 5, 7, 9), dtype=jnp.float32)
    target3 = (jax.random.uniform(k2, (2, 3, 5, 7, 9)) > 0.5).astype(jnp.float32)
    out3 = jax.block_until_ready(dice_loss(logits3, target3))
    ref3 = jax.block_until_ready(_dice_loss_ref(logits3, target3))
    assert jnp.allclose(out3, ref3, rtol=1e-4, atol=1e-4), (out3, ref3)

    print("KERNEL_OK")
</pallas_src>

<mosaic_0001>
module attributes {stable_mosaic.version = 11 : i64} {
  func.func @_dice_rows_kernel(%arg0: i32, %arg1: memref<8x16x128xf32, #tpu.memory_space<vmem>>, %arg2: memref<8x16x128xf32, #tpu.memory_space<vmem>>, %arg3: memref<8x128xf32, #tpu.memory_space<vmem>>, %arg4: memref<8x128xf32, #tpu.memory_space<vmem>>) attributes {dimension_semantics = [#tpu.dimension_semantics<parallel>], iteration_bounds = array<i64: 1>, scalar_prefetch = 0 : i64, scratch_operands = 0 : i64, tpu.core_type = #tpu.core_type<tc>, window_params = [{transform_indices = @transform_0, window_bounds = array<i64: 8, 16, 128>}, {transform_indices = @transform_1, window_bounds = array<i64: 8, 16, 128>}, {transform_indices = @transform_2, window_bounds = array<i64: 8, 128>}, {transform_indices = @transform_3, window_bounds = array<i64: 8, 128>}]} {
    %c0 = arith.constant 0 : index
    %c0_0 = arith.constant 0 : index
    %c0_1 = arith.constant 0 : index
    %0 = vector.load %arg1[%c0, %c0_0, %c0_1] : memref<8x16x128xf32, #tpu.memory_space<vmem>>, vector<8x16x128xf32>
    %c0_2 = arith.constant 0 : index
    %c0_3 = arith.constant 0 : index
    %c0_4 = arith.constant 0 : index
    %1 = vector.load %arg2[%c0_2, %c0_3, %c0_4] : memref<8x16x128xf32, #tpu.memory_space<vmem>>, vector<8x16x128xf32>
    %cst = arith.constant 5.000000e-01 : f32
    %2 = vector.broadcast %cst : f32 to vector<8x16x128xf32>
    %3 = arith.mulf %2, %0 : vector<8x16x128xf32>
    %4 = math.tanh %3 : vector<8x16x128xf32>
    %cst_5 = arith.constant 5.000000e-01 : f32
    %5 = vector.broadcast %cst_5 : f32 to vector<8x16x128xf32>
    %6 = arith.mulf %5, %4 : vector<8x16x128xf32>
    %cst_6 = arith.constant 5.000000e-01 : f32
    %7 = vector.broadcast %cst_6 : f32 to vector<8x16x128xf32>
    %8 = arith.addf %7, %6 : vector<8x16x128xf32>
    %9 = arith.mulf %8, %1 : vector<8x16x128xf32>
    %cst_7 = arith.constant dense<0.000000e+00> : vector<8x128xf32>
    %10 = vector.multi_reduction <add>, %9, %cst_7 [1] : vector<8x16x128xf32> to vector<8x128xf32>
    %c0_8 = arith.constant 0 : index
    %c0_9 = arith.constant 0 : index
    %11 = vector.load %arg3[%c0_8, %c0_9] : memref<8x128xf32, #tpu.memory_space<vmem>>, vector<8x128xf32>
    tpu.vector_store %arg3[%c0_8, %c0_9], %10 {strides = array<i32>} : memref<8x128xf32, #tpu.memory_space<vmem>>, vector<8x128xf32>,
    %12 = arith.addf %8, %1 : vector<8x16x128xf32>
    %cst_10 = arith.constant dense<0.000000e+00> : vector<8x128xf32>
    %13 = vector.multi_reduction <add>, %12, %cst_10 [1] : vector<8x16x128xf32> to vector<8x128xf32>
    %c0_11 = arith.constant 0 : index
    %c0_12 = arith.constant 0 : index
    %14 = vector.load %arg4[%c0_11, %c0_12] : memref<8x128xf32, #tpu.memory_space<vmem>>, vector<8x128xf32>
    tpu.vector_store %arg4[%c0_11, %c0_12], %13 {strides = array<i32>} : memref<8x128xf32, #tpu.memory_space<vmem>>, vector<8x128xf32>,
    return
  }
  func.func @transform_0(%arg0: i32) -> (i32, i32, i32) {
    %c0_i32 = arith.constant 0 : i32
    %c0_i32_0 = arith.constant 0 : i32
    %c0_i32_1 = arith.constant 0 : i32
    return %arg0, %c0_i32, %c0_i32_0 : i32, i32, i32
  }
  func.func @transform_1(%arg0: i32) -> (i32, i32, i32) {
    %c0_i32 = arith.constant 0 : i32
    %c0_i32_0 = arith.constant 0 : i32
    %c0_i32_1 = arith.constant 0 : i32
    return %arg0, %c0_i32, %c0_i32_0 : i32, i32, i32
  }
  func.func @transform_2(%arg0: i32) -> (i32, i32) {
    %c0_i32 = arith.constant 0 : i32
    %c0_i32_0 = arith.constant 0 : i32
    return %arg0, %c0_i32 : i32, i32
  }
  func.func @transform_3(%arg0: i32) -> (i32, i32) {
    %c0_i32 = arith.constant 0 : i32
    %c0_i32_0 = arith.constant 0 : i32
    return %arg0, %c0_i32 : i32, i32
  }
}

</mosaic_0001>

<bundles_post_ra>
// kernel: tpu_custom_call.1
= control target key start
LH: loop header
LB: loop body
LE: loop exit
PB: predicated region body
PF: predicated region fallthrough
CT: control target
= control target key end

     0   :  { %9 = vsyncpa [#allocation3], 0  ;;  %s687_s0 = inlined_call_operand.hbm [shape: f32[8,16,128], index: 0, kind: input, shape index: {}]   ;;  %s688_s1 = inlined_call_operand.hbm [shape: f32[8,16,128], index: 1, kind: input, shape index: {}]   ;;  %s689_s2 = inlined_call_operand.hbm [shape: f32[8,128], index: 2, kind: output, shape index: {0}]   ;;  %s690_s3 = inlined_call_operand.hbm [shape: f32[8,128], index: 3, kind: output, shape index: {1}]  }
   0x1   :  { %10 = vsyncpa [#allocation6], 0 }
   0x2   :  { %11 = vsyncpa [#allocation4], 0 }
   0x3   :  { %12 = vsyncpa [#allocation9], 0  ;;  %s17_s14 = sshll.u32 %s687_s0, 4  ;;  %s504_s15 = smov [#allocation2]   ;;  %s18_s14 = int_to_ptr.hbm [resolvable:$true] %s17_s14 }
   0x4   :  { %s19_s16 = sshll.u32 %s504_s15, 4  ;;  %s30_s19 = sshll.u32 %s688_s1, 4  ;;  %s20_s16 = int_to_ptr.vmem [resolvable:$true] %s19_s16  ;;  %s31_s19 = int_to_ptr.hbm [resolvable:$true] %s30_s19 }
   0x5   :  { %s505_s20 = smov 128   ;;  %s506_s21 = smov 8  }
   0x6   :  { %25 = dma.hbm_to_vmem [thread:$0]  %s18_s14, 2048, %s20_s16, [#allocation3], %s505_s20, %s505_s20, %s506_s21  }
   0x7   :  { %s507_s22 = smov [#allocation5]  }
   0x8   :  { %s32_s23 = sshll.u32 %s507_s22, 4  ;;  %s33_s23 = int_to_ptr.vmem [resolvable:$true] %s32_s23 }
   0x9   :  { %38 = dma.hbm_to_vmem [thread:$0]  %s31_s19, 2048, %s33_s23, [#allocation6], %s505_s20, %s505_s20, %s506_s21  }
   0xa   :  { %496 = dma.done.wait [#allocation3], 2048  }
   0xb   :  { %497 = vsyncadd [#allocation3], 4294965248 }
   0xc   :  { %498 = dma.done.wait [#allocation6], 2048  }
   0xd   :  { %499 = vsyncadd [#allocation6], 4294965248  ;;  %v47_v0 = vld [vmem:[#allocation2] sm:$0xff]  ;;  %v48_v1 = vld [vmem:[#allocation2 + $0x8] sm:$0xff]  ;;  %vm223_vm0 = vcmask 1041409   ;;  %vm225_vm1 = vcmask 1042434  }
   0xe   :  { %v49_v2 = vld [vmem:[#allocation2 + $0x10] sm:$0xff]  ;;  %v50_v3 = vld [vmem:[#allocation2 + $0x18] sm:$0xff]  ;;  %v51_v4 = vld [vmem:[#allocation2 + $0x20] sm:$0xff]  ;;  %v79_v6 = vmul.f32 0.5, %v47_v0  ;;  %v80_v7 = vmul.f32 0.5, %v48_v1  ;;  %vm227_vm2 = vcmask 1043459  }
   0xf   :  { %v52_v5 = vld [vmem:[#allocation2 + $0x28] sm:$0xff]  ;;  %v81_v8 = vmul.f32 0.5, %v49_v2  ;;  %v53_v9 = vld [vmem:[#allocation2 + $0x30] sm:$0xff]  ;;  %v82_v10 = vmul.f32 0.5, %v50_v3  ;;  %v54_v11 = vld [vmem:[#allocation2 + $0x38] sm:$0xff]  ;;  %v83_v12 = vmul.f32 0.5, %v51_v4 }
  0x10   :  { %368 = vtanh.f32 %v79_v6  ;;  %v55_v13 = vld [vmem:[#allocation2 + $0x40] sm:$0xff]  ;;  %v84_v14 = vmul.f32 0.5, %v52_v5  ;;  %v56_v15 = vld [vmem:[#allocation2 + $0x48] sm:$0xff]  ;;  %v85_v16 = vmul.f32 0.5, %v53_v9  ;;  %v57_v17 = vld [vmem:[#allocation2 + $0x50] sm:$0xff]  ;;  %v86_v18 = vmul.f32 0.5, %v54_v11 }
  0x11   :  { %370 = vtanh.f32 %v80_v7  ;;  %v58_v19 = vld [vmem:[#allocation2 + $0x58] sm:$0xff]  ;;  %v87_v20 = vmul.f32 0.5, %v55_v13  ;;  %v59_v21 = vld [vmem:[#allocation2 + $0x60] sm:$0xff]  ;;  %v60_v22 = vld [vmem:[#allocation2 + $0x68] sm:$0xff]  ;;  %v88_v23 = vmul.f32 0.5, %v56_v15  ;;  %v89_v26 = vmul.f32 0.5, %v57_v17 }
  0x12   :  { %372 = vtanh.f32 %v81_v8  ;;  %v61_v25 = vld [vmem:[#allocation2 + $0x70] sm:$0xff]  ;;  %v62_v28 = vld [vmem:[#allocation2 + $0x78] sm:$0xff]  ;;  %v90_v29 = vmul.f32 0.5, %v58_v19  ;;  %v536_v32 = vld [vmem:[#allocation5] sm:$0xff]  ;;  %v91_v33 = vmul.f32 0.5, %v59_v21  ;;  %v92_v34 = vmul.f32 0.5, %v60_v22 }
  0x13   :  { %374 = vtanh.f32 %v82_v10  ;;  %v538_v37 = vld [vmem:[#allocation5 + $0x8] sm:$0xff]  ;;  %v93_v38 = vmul.f32 0.5, %v61_v25  ;;  %v542_v42 = vld [vmem:[#allocation5 + $0x10] sm:$0xff]  ;;  %v94_v43 = vmul.f32 0.5, %v62_v28  ;;  %v546_v47 = vld [vmem:[#allocation5 + $0x18] sm:$0xff]  ;;  %vm229_vm3 = vcmask 1044484  }
  0x14   :  { %376 = vtanh.f32 %v83_v12  ;;  %v552_v52 = vld [vmem:[#allocation5 + $0x20] sm:$0xff]  ;;  %v558_v57 = vld [vmem:[#allocation5 + $0x28] sm:$0xff]  ;;  %v564_v62 = vld [vmem:[#allocation5 + $0x30] sm:$0xff]  ;;  %vm231_vm4 = vcmask 1045509   ;;  %vm233_vm5 = vcmask 1046534   ;;  %vm235_vm6 = vcmask 1047559  }
  0x15   :  { %378 = vtanh.f32 %v84_v14  ;;  %v570_v3 = vld [vmem:[#allocation5 + $0x38] sm:$0xff]  ;;  %v576_v8 = vld [vmem:[#allocation5 + $0x40] sm:$0xff]  ;;  %v582_v14 = vld [vmem:[#allocation5 + $0x48] sm:$0xff]  ;;  %s508_s0 = smov [#allocation7]   ;;  %s335_s26 = sshll.u32 %s689_s2, 4  ;;  %s336_s26 = int_to_ptr.hbm [resolvable:$true] %s335_s26 }
  0x16   :  { %v369_v24 = vpop.eup %368  ;;  %380 = vtanh.f32 %v85_v16  ;;  %s651_s1 = sshll.u32 %s508_s0, 4  ;;  %s509_s2 = smov [#allocation8]   ;;  %s334_s1 = int_to_ptr.vmem [resolvable:$true] %s651_s1 }
  0x17   :  { %v371_v27 = vpop.eup %370  ;;  %382 = vtanh.f32 %v86_v18  ;;  %v111_v30 = vmul.f32 0.5, %v369_v24  ;;  %s344_s27 = sshll.u32 %s509_s2, 4  ;;  %s346_s30 = sshll.u32 %s690_s3, 4  ;;  %s345_s27 = int_to_ptr.vmem [resolvable:$true] %s344_s27  ;;  %s347_s30 = int_to_ptr.hbm [resolvable:$true] %s346_s30 }
  0x18   :  { %v373_v31 = vpop.eup %372  ;;  %384 = vtanh.f32 %v87_v20  ;;  %v112_v35 = vmul.f32 0.5, %v371_v27  ;;  %v588_v20 = vld [vmem:[#allocation5 + $0x50] sm:$0xff] }
  0x19   :  { %v375_v36 = vpop.eup %374  ;;  %386 = vtanh.f32 %v88_v23  ;;  %v113_v39 = vmul.f32 0.5, %v373_v31  ;;  %v540_v40 = vadd.f32 0.5, %v111_v30 }
  0x1a   :  { %v377_v41 = vpop.eup %376  ;;  %388 = vtanh.f32 %v89_v26  ;;  %v114_v44 = vmul.f32 0.5, %v375_v36  ;;  %v544_v45 = vadd.f32 0.5, %v112_v35  ;;  %v594_v26 = vld [vmem:[#allocation5 + $0x58] sm:$0xff] }
  0x1b   :  { %v379_v46 = vpop.eup %378  ;;  %390 = vtanh.f32 %v90_v29  ;;  %v115_v48 = vmul.f32 0.5, %v377_v41  ;;  %v548_v49 = vadd.f32 0.5, %v113_v39  ;;  %v143_v50 = vmul.f32 %v540_v40, %v536_v32  ;;  %v606_v41 = vld [vmem:[#allocation5 + $0x68] sm:$0xff] }
  0x1c   :  { %v381_v51 = vpop.eup %380  ;;  %392 = vtanh.f32 %v91_v33  ;;  %v116_v53 = vmul.f32 0.5, %v379_v46  ;;  %v554_v54 = vadd.f32 0.5, %v114_v44  ;;  %v144_v55 = vmul.f32 %v544_v45, %v538_v37  ;;  %v600_v33 = vld [vmem:[#allocation5 + $0x60] sm:$0xff] }
  0x1d   :  { %v383_v56 = vpop.eup %382  ;;  %394 = vtanh.f32 %v92_v34  ;;  %v117_v58 = vmul.f32 0.5, %v381_v51  ;;  %v560_v59 = vadd.f32 0.5, %v115_v48  ;;  %v145_v60 = vmul.f32 %v548_v49, %v542_v42 }
  0x1e   :  { %v385_v61 = vpop.eup %384  ;;  %396 = vtanh.f32 %v93_v38  ;;  %v118_v63 = vmul.f32 0.5, %v383_v56  ;;  %v566_v0 = vadd.f32 0.5, %v116_v53  ;;  %v146_v1 = vmul.f32 %v554_v54, %v546_v47 }
  0x1f   :  { %v387_v2 = vpop.eup %386  ;;  %398 = vtanh.f32 %v94_v43  ;;  %v119_v4 = vmul.f32 0.5, %v385_v61  ;;  %v572_v5 = vadd.f32 0.5, %v117_v58  ;;  %v147_v6 = vmul.f32 %v560_v59, %v552_v52  ;;  %v618_v58 = vld [vmem:[#allocation5 + $0x78] sm:$0xff] }
  0x20   :  { %v389_v7 = vpop.eup %388  ;;  %v120_v9 = vmul.f32 0.5, %v387_v2  ;;  %v578_v10 = vadd.f32 0.5, %v118_v63  ;;  %v148_v11 = vmul.f32 %v566_v0, %v558_v57  ;;  %v159_v12 = vadd.f32 %v144_v55, %v143_v50  ;;  %v612_v50 = vld [vmem:[#allocation5 + $0x70] sm:$0xff] }
  0x21   :  { %v391_v13 = vpop.eup %390  ;;  %v121_v15 = vmul.f32 0.5, %v389_v7  ;;  %v584_v16 = vadd.f32 0.5, %v119_v4  ;;  %v149_v17 = vmul.f32 %v572_v5, %v564_v62  ;;  %v166_v18 = vadd.f32 %v146_v1, %v145_v60 }
  0x22   :  { %v393_v19 = vpop.eup %392  ;;  %v122_v21 = vmul.f32 0.5, %v391_v13  ;;  %v590_v22 = vadd.f32 0.5, %v120_v9  ;;  %v150_v23 = vmul.f32 %v578_v10, %v570_v3  ;;  %v160_v24 = vrot.slane %v159_v12, 4 }
  0x23   :  { %v395_v25 = vpop.eup %394  ;;  %v123_v27 = vmul.f32 0.5, %v393_v19  ;;  %v596_v28 = vadd.f32 0.5, %v121_v15  ;;  %v151_v29 = vmul.f32 %v584_v16, %v576_v8  ;;  %v167_v30 = vrot.slane %v166_v18, 4 }
  0x24   :  { %v397_v31 = vpop.eup %396  ;;  %v124_v34 = vmul.f32 0.5, %v395_v25  ;;  %v602_v35 = vadd.f32 0.5, %v122_v21  ;;  %v152_v36 = vmul.f32 %v590_v22, %v582_v14  ;;  %v161_v38 = vadd.f32 %v160_v24, %v159_v12 }
  0x25   :  { %v399_v39 = vpop.eup %398  ;;  %v125_v43 = vmul.f32 0.5, %v397_v31  ;;  %v608_v44 = vadd.f32 0.5, %v123_v27  ;;  %v153_v46 = vmul.f32 %v596_v28, %v588_v20  ;;  %v168_v48 = vadd.f32 %v167_v30, %v166_v18 }
  0x26   :  { %v126_v51 = vmul.f32 0.5, %v399_v39  ;;  %v614_v53 = vadd.f32 0.5, %v124_v34  ;;  %v154_v55 = vmul.f32 %v602_v35, %v594_v26  ;;  %v162_v56 = vrot.slane %v161_v38, 2 }
  0x27   :  { %v620_v60 = vadd.f32 0.5, %v125_v43  ;;  %v155_v61 = vmul.f32 %v608_v44, %v600_v33  ;;  %v169_v63 = vrot.slane %v168_v48, 2  ;;  %v173_v1 = vadd.f32 %v148_v11, %v147_v6 }
  0x28   :  { %v624_v2 = vadd.f32 0.5, %v126_v51  ;;  %v156_v4 = vmul.f32 %v614_v53, %v606_v41  ;;  %v163_v7 = vadd.f32 %v162_v56, %v161_v38  ;;  %v180_v9 = vadd.f32 %v150_v23, %v149_v17 }
  0x29   :  { %v157_v12 = vmul.f32 %v620_v60, %v612_v50  ;;  %v170_v13 = vadd.f32 %v169_v63, %v168_v48  ;;  %v174_v15 = vrot.slane %v173_v1, 4  ;;  %v187_v18 = vadd.f32 %v152_v36, %v151_v29 }
  0x2a   :  { %v158_v19 = vmul.f32 %v624_v2, %v618_v58  ;;  %v164_v21 = vrot.slane %v163_v7, 1  ;;  %v181_v24 = vrot.slane %v180_v9, 4  ;;  %v194_v25 = vadd.f32 %v154_v55, %v153_v46 }
  0x2b   :  { %v171_v6 = vrot.slane %v170_v13, 1  ;;  %v175_v11 = vadd.f32 %v174_v15, %v173_v1  ;;  %v188_v27 = vrot.slane %v187_v18, 4  ;;  %v201_v30 = vadd.f32 %v156_v4, %v155_v61 }
  0x2c   :  { %v165_v31 = vadd.f32 %v164_v21, %v163_v7  ;;  %v182_v17 = vadd.f32 %v181_v24, %v180_v9  ;;  %v195_v23 = vrot.slane %v194_v25, 4  ;;  %v208_v34 = vadd.f32 %v158_v19, %v157_v12 }
  0x2d   :  { %v172_v38 = vadd.f32 %v171_v6, %v170_v13  ;;  %v176_v39 = vrot.slane %v175_v11, 2  ;;  %v189_v29 = vadd.f32 %v188_v27, %v187_v18  ;;  %v202_v36 = vrot.slane %v201_v30, 4 }
  0x2e   :  { %v183_v43 = vrot.slane %v182_v17, 2  ;;  %v196_v48 = vadd.f32 %v195_v23, %v194_v25  ;;  %v209_v51 = vrot.slane %v208_v34, 4  ;;  %v239_v46 = vadd.f32 %v540_v40, %v536_v32 }
  0x2f   :  { %v177_v55 = vadd.f32 %v176_v39, %v175_v11  ;;  %v190_v56 = vrot.slane %v189_v29, 2  ;;  %v203_v61 = vadd.f32 %v202_v36, %v201_v30  ;;  %v224_v63 = vsel %vm223_vm0, %v172_v38, %v165_v31 }
  0x30   :  { %v184_v1 = vadd.f32 %v183_v43, %v182_v17  ;;  %v197_v4 = vrot.slane %v196_v48, 2  ;;  %v210_v7 = vadd.f32 %v209_v51, %v208_v34  ;;  %v240_v9 = vadd.f32 %v544_v45, %v538_v37 }
  0x31   :  { %v178_v12 = vrot.slane %v177_v55, 1  ;;  %v191_v13 = vadd.f32 %v190_v56, %v189_v29  ;;  %v204_v15 = vrot.slane %v203_v61, 2  ;;  %v241_v18 = vadd.f32 %v548_v49, %v542_v42 }
  0x32   :  { %v185_v19 = vrot.slane %v184_v1, 1  ;;  %v198_v32 = vadd.f32 %v197_v4, %v196_v48  ;;  %v211_v40 = vrot.slane %v210_v7, 2  ;;  %v242_v21 = vadd.f32 %v554_v54, %v546_v47 }
  0x33   :  { %v179_v24 = vadd.f32 %v178_v12, %v177_v55  ;;  %v192_v25 = vrot.slane %v191_v13, 1  ;;  %v205_v6 = vadd.f32 %v204_v15, %v203_v61  ;;  %v243_v11 = vadd.f32 %v560_v59, %v552_v52 }
  0x34   :  { %v186_v27 = vadd.f32 %v185_v19, %v184_v1  ;;  %v199_v37 = vrot.slane %v198_v32, 1  ;;  %v212_v45 = vadd.f32 %v211_v40, %v210_v7  ;;  %v244_v30 = vadd.f32 %v566_v0, %v558_v57 }
  0x35   :  { %v193_v31 = vadd.f32 %v192_v25, %v191_v13  ;;  %v206_v42 = vrot.slane %v205_v6, 1  ;;  %v226_v49 = vsel %vm225_vm1, %v179_v24, %v224_v63  ;;  %v245_v17 = vadd.f32 %v572_v5, %v564_v62 }
  0x36   :  { %v200_v47 = vadd.f32 %v199_v37, %v198_v32  ;;  %v213_v54 = vrot.slane %v212_v45, 1  ;;  %v228_v23 = vsel %vm227_vm2, %v186_v27, %v226_v49  ;;  %v246_v52 = vadd.f32 %v578_v10, %v570_v3 }
  0x37   :  { %v207_v57 = vadd.f32 %v206_v42, %v205_v6  ;;  %v230_v59 = vsel %vm229_vm3, %v193_v31, %v228_v23  ;;  %v247_v62 = vadd.f32 %v584_v16, %v576_v8  ;;  %v248_v0 = vadd.f32 %v590_v22, %v582_v14 }
  0x38   :  { %v214_v5 = vadd.f32 %v213_v54, %v212_v45  ;;  %v232_v3 = vsel %vm231_vm4, %v200_v47, %v230_v59  ;;  %v249_v10 = vadd.f32 %v596_v28, %v588_v20  ;;  %v250_v34 = vadd.f32 %v602_v35, %v594_v26 }
  0x39   :  { %v234_v38 = vsel %vm233_vm5, %v207_v57, %v232_v3  ;;  %v251_v39 = vadd.f32 %v608_v44, %v600_v33  ;;  %v252_v8 = vadd.f32 %v614_v53, %v606_v41  ;;  %v253_v14 = vadd.f32 %v620_v60, %v612_v50 }
  0x3a   :  { %v236_v16 = vsel %vm235_vm6, %v214_v5, %v234_v38  ;;  %v254_v20 = vadd.f32 %v624_v2, %v618_v58  ;;  %v255_v22 = vadd.f32 %v240_v9, %v239_v46  ;;  %v262_v26 = vadd.f32 %v242_v21, %v241_v18 }
  0x3b   :  { %238 = vst [vmem:[#allocation7] sm:$0xff] %v236_v16  ;;  %v269_v28 = vadd.f32 %v244_v30, %v243_v11  ;;  %v276_v35 = vadd.f32 %v246_v52, %v245_v17  ;;  %v283_v29 = vadd.f32 %v248_v0, %v247_v62  ;;  %v290_v33 = vadd.f32 %v250_v34, %v249_v10 }
  0x3c   :  { %v256_v44 = vrot.slane %v255_v22, 4  ;;  %v263_v36 = vrot.slane %v262_v26, 4  ;;  %v297_v41 = vadd.f32 %v252_v8, %v251_v39  ;;  %v304_v53 = vadd.f32 %v254_v20, %v253_v14  ;;  %338 = dma.vmem_to_hbm [thread:$0]  %s334_s1, 128, %s336_s26, [#allocation4]  }
  0x3d   :  { %v270_v50 = vrot.slane %v269_v28, 4  ;;  %v277_v60 = vrot.slane %v276_v35, 4  ;;  %v284_v43 = vrot.slane %v283_v29, 4  ;;  %v291_v48 = vrot.slane %v290_v33, 4 }
  0x3e   :  { %v257_v51 = vadd.f32 %v256_v44, %v255_v22  ;;  %v264_v55 = vadd.f32 %v263_v36, %v262_v26  ;;  %v298_v56 = vrot.slane %v297_v41, 4  ;;  %v305_v58 = vrot.slane %v304_v53, 4 }
  0x3f   :  { %v271_v2 = vadd.f32 %v270_v50, %v269_v28  ;;  %v278_v46 = vadd.f32 %v277_v60, %v276_v35  ;;  %v285_v61 = vadd.f32 %v284_v43, %v283_v29  ;;  %v292_v63 = vadd.f32 %v291_v48, %v290_v33 }
  0x40   :  { %v258_v1 = vrot.slane %v257_v51, 2  ;;  %v265_v4 = vrot.slane %v264_v55, 2  ;;  %v299_v7 = vadd.f32 %v298_v56, %v297_v41  ;;  %v306_v9 = vadd.f32 %v305_v58, %v304_v53 }
  0x41   :  { %v272_v12 = vrot.slane %v271_v2, 2  ;;  %v279_v13 = vrot.slane %v278_v46, 2  ;;  %v286_v15 = vrot.slane %v285_v61, 2  ;;  %v293_v18 = vrot.slane %v292_v63, 2 }
  0x42   :  { %v259_v19 = vadd.f32 %v258_v1, %v257_v51  ;;  %v266_v32 = vadd.f32 %v265_v4, %v264_v55  ;;  %v300_v40 = vrot.slane %v299_v7, 2  ;;  %v307_v21 = vrot.slane %v306_v9, 2 }
  0x43   :  { %v273_v24 = vadd.f32 %v272_v12, %v271_v2  ;;  %v280_v25 = vadd.f32 %v279_v13, %v278_v46  ;;  %v287_v6 = vadd.f32 %v286_v15, %v285_v61  ;;  %v294_v11 = vadd.f32 %v293_v18, %v292_v63 }
  0x44   :  { %v260_v27 = vrot.slane %v259_v19, 1  ;;  %v267_v37 = vrot.slane %v266_v32, 1  ;;  %v301_v45 = vadd.f32 %v300_v40, %v299_v7  ;;  %v308_v30 = vadd.f32 %v307_v21, %v306_v9 }
  0x45   :  { %v274_v31 = vrot.slane %v273_v24, 1  ;;  %v281_v42 = vrot.slane %v280_v25, 1  ;;  %v288_v49 = vrot.slane %v287_v6, 1  ;;  %v295_v17 = vrot.slane %v294_v11, 1 }
  0x46   :  { %v261_v47 = vadd.f32 %v260_v27, %v259_v19  ;;  %v268_v54 = vadd.f32 %v267_v37, %v266_v32  ;;  %v302_v23 = vrot.slane %v301_v45, 1  ;;  %v309_v52 = vrot.slane %v308_v30, 1 }
  0x47   :  { %v275_v57 = vadd.f32 %v274_v31, %v273_v24  ;;  %v282_v59 = vadd.f32 %v281_v42, %v280_v25  ;;  %v289_v62 = vadd.f32 %v288_v49, %v287_v6  ;;  %v296_v0 = vadd.f32 %v295_v17, %v294_v11 }
  0x48   :  { %v319_v5 = vsel %vm223_vm0, %v268_v54, %v261_v47  ;;  %v303_v3 = vadd.f32 %v302_v23, %v301_v45  ;;  %v310_v34 = vadd.f32 %v309_v52, %v308_v30 }
  0x49   :  { %v320_v10 = vsel %vm225_vm1, %v275_v57, %v319_v5 }
  0x4a   :  { %v321_v38 = vsel %vm227_vm2, %v282_v59, %v320_v10 }
  0x4b   :  { %v322_v39 = vsel %vm229_vm3, %v289_v62, %v321_v38 }
  0x4c   :  { %v323_v8 = vsel %vm231_vm4, %v296_v0, %v322_v39 }
  0x4d   :  { %v324_v14 = vsel %vm233_vm5, %v303_v3, %v323_v8 }
  0x4e   :  { %v325_v16 = vsel %vm235_vm6, %v310_v34, %v324_v14 }
  0x4f   :  { %327 = vst [vmem:[#allocation8] sm:$0xff] %v325_v16 }
  0x50   :  { %349 = dma.vmem_to_hbm [thread:$0]  %s345_s27, 128, %s347_s30, [#allocation9]  }
  0x51   :  { %500 = dma.done.wait [#allocation4], 128  }
  0x52   :  { %501 = vsyncadd [#allocation4], 4294967168 }
  0x53   :  { %502 = dma.done.wait [#allocation9], 128  }
  0x54   :  { %503 = vsyncadd [#allocation9], 4294967168 }
  0x55   :  { %358 = vsyncpa [#allocation3], 1 }
  0x56   :  { %359 = vsyncpa [#allocation6], 1 }
  0x57   :  { %360 = vsyncpa [#allocation4], 1 }
  0x58   :  { %361 = vsyncpa [#allocation9], 1 }

</bundles_post_ra>
